<compile_context>
chip_gen: v5e
topology: v5e:2x2
jax: 0.10.0
libtpu: 0.0.40
codegen_flags: <defaults>
</compile_context>

<pallas_src>
import jax
import jax.numpy as jnp
from jax.experimental import pallas as pl
from jax.experimental.pallas import tpu as pltpu


def _cdiv(a, b):
    return -(-a // b)


def _vmem_limit_bytes():
    """Derive a scoped-VMEM limit from the chip (fallback: conservative 64 MiB)."""
    cap = 64 << 20
    try:
        info = pltpu.get_tpu_info()
        cap = int(getattr(info, "vmem_capacity_bytes", cap))
    except Exception:
        pass
    # leave headroom for compiler scratch; 48 MiB on v7x (64 MiB VMEM), 96 MiB on v5e/v6e
    return int(min(max(cap * 3 // 4, 32 << 20), 96 << 20))


def _pick_tiles(R, L, in_bytes, out_bytes, block_budget):
    """Pick (tile_r, tile_c). tile_r: full R or a multiple of 32 (legal for u8 & f32).
    tile_c: multiple of 128 (or full L), sized for VMEM budget and >= ~8 even grid steps."""
    bytes_pair = in_bytes + out_bytes

    # Row tile: keep all (n, c) planes together unless R is huge.
    if R <= 32 or R * 128 * bytes_pair <= block_budget:
        tile_r = R
    else:
        tile_r = min(R, max(32, ((block_budget // (128 * bytes_pair)) // 32) * 32))

    # Lane tile.
    if L <= 128:
        return tile_r, L

    lane_groups = _cdiv(L, 128)
    budget_groups = max(1, block_budget // (tile_r * 128 * bytes_pair))
    if lane_groups >= 8:
        steps_groups = max(1, lane_groups // 8)      # aim for >= 8 pipelined steps
    else:
        steps_groups = max(1, _cdiv(lane_groups, 2))  # small images: still >= 2 steps
    tile_c = 128 * max(1, min(budget_groups, steps_groups))

    # v7x megacore: prefer an even number of lane-axis steps so both TCs get equal work.
    steps = _cdiv(L, tile_c)
    if steps > 1 and steps % 2 == 1:
        alt_tile_c = 128 * max(1, _cdiv(lane_groups, steps + 1))
        if _cdiv(L, alt_tile_c) % 2 == 0:
            tile_c = alt_tile_c
    return tile_r, tile_c


def normalizer_kernel(x_ref, scale_ref, bias_ref, o_ref):
    # x_ref: (tile_r, tile_c) tile in its native dtype (uint8 / f32 / ...).
    # scale_ref / bias_ref: (tile_r, 1) f32 columns, broadcast along lanes.
    x = x_ref[...].astype(jnp.float32)
    o_ref[...] = (x * scale_ref[...] + bias_ref[...]).astype(o_ref.dtype)


def _normalizer(x, mean, std, out_dtype=jnp.float32):
    N, C, H, W = x.shape
    R, L = N * C, H * W

    # Per-(n, c) affine coefficients: only batch element 0, channels < 3 are
    # mean/std-normalized (matching the PyTorch in-place loop); everything else
    # is just divided by 255.  (Folded FMA is ~1-2 ulp off the exact op order.)
    cn = min(C, 3)
    scale_nc = jnp.full((N, C), 1.0 / 255.0, dtype=jnp.float32)
    bias_nc = jnp.zeros((N, C), dtype=jnp.float32)
    scale_nc = scale_nc.at[0, :cn].set(1.0 / (255.0 * std[:cn]))
    bias_nc = bias_nc.at[0, :cn].set(-mean[:cn] / std[:cn])
    scale = scale_nc.reshape(R, 1)
    bias = bias_nc.reshape(R, 1)

    # Lane-dense 2D slab: rows = (n, c) planes, columns = flattened spatial dims.
    x2 = x.reshape(R, L)

    vmem_limit = _vmem_limit_bytes()
    block_budget = vmem_limit // 4  # per-block (in+out) bytes; double-buffered ~ limit/2
    in_bytes = jnp.dtype(x.dtype).itemsize
    out_bytes = jnp.dtype(out_dtype).itemsize
    tile_r, tile_c = _pick_tiles(R, L, in_bytes, out_bytes, block_budget)
    grid = (_cdiv(R, tile_r), _cdiv(L, tile_c))  # cdiv: ragged last block is masked

    out2 = pl.pallas_call(
        normalizer_kernel,
        grid=grid,
        in_specs=[
            pl.BlockSpec((tile_r, tile_c), lambda i, j: (i, j)),   # x (native dtype)
            pl.BlockSpec((tile_r, 1), lambda i, j: (i, 0)),        # scale (re-DMA elided)
            pl.BlockSpec((tile_r, 1), lambda i, j: (i, 0)),        # bias
        ],
        out_specs=pl.BlockSpec((tile_r, tile_c), lambda i, j: (i, j)),
        out_shape=jax.ShapeDtypeStruct((R, L), out_dtype),
        compiler_params=pltpu.CompilerParams(
            dimension_semantics=("parallel", "parallel"),
            vmem_limit_bytes=vmem_limit,
        ),
    )(x2, scale, bias)

    return out2.reshape(N, C, H, W)


# jit the wrapper so the tiny coefficient-scatter ops fuse into the dispatch.
normalizer = jax.jit(_normalizer, static_argnames=("out_dtype",))


if __name__ == "__main__":
    mean = jnp.array([0.485, 0.456, 0.406], dtype=jnp.float32)
    std = jnp.array([0.229, 0.224, 0.225], dtype=jnp.float32)

    def reference(x, mean, std):
        t = x.astype(jnp.float32) / 255.0
        cn = min(x.shape[1], 3)
        t = t.at[0, :cn].set((t[0, :cn] - mean[:cn, None, None]) / std[:cn, None, None])
        return t

    ok = True

    # 1) f32 input, spatial dims aligned to 128 lanes.
    x1 = jax.random.uniform(jax.random.PRNGKey(0), (2, 3, 16, 16), dtype=jnp.float32) * 255.0
    o1 = jax.block_until_ready(normalizer(x1, mean, std))
    ok &= bool(jnp.allclose(o1, reference(x1, mean, std), atol=1e-5, rtol=1e-5))

    # 2) uint8 input (1 B/elem HBM reads), ragged spatial dims (H*W % 128 != 0).
    x2 = jax.random.randint(jax.random.PRNGKey(1), (2, 3, 20, 20), 0, 256,
                            dtype=jnp.int32).astype(jnp.uint8)
    o2 = jax.block_until_ready(normalizer(x2, mean, std))
    ok &= bool(jnp.allclose(o2, reference(x2, mean, std), atol=1e-5, rtol=1e-5))

    # 3) uint8 input with bf16 output (minimum-traffic path, 3 B/elem total).
    o3 = jax.block_until_ready(normalizer(x2, mean, std, out_dtype=jnp.bfloat16))
    ok &= bool(jnp.allclose(o3.astype(jnp.float32), reference(x2, mean, std),
                            atol=2e-2, rtol=2e-2))

    assert o1.shape == (2, 3, 16, 16) and o1.dtype == jnp.float32
    assert o2.shape == (2, 3, 20, 20) and o2.dtype == jnp.float32
    assert o3.dtype == jnp.bfloat16
    assert ok, "mismatch vs reference"
    print("KERNEL_OK")
</pallas_src>

<mosaic_0001>
module attributes {stable_mosaic.version = 11 : i64} {
  func.func @normalizer_kernel(%arg0: i32, %arg1: i32, %arg2: memref<6x128xf32, #tpu.memory_space<vmem>>, %arg3: memref<6x1xf32, #tpu.memory_space<vmem>>, %arg4: memref<6x1xf32, #tpu.memory_space<vmem>>, %arg5: memref<6x128xf32, #tpu.memory_space<vmem>>) attributes {dimension_semantics = [#tpu.dimension_semantics<parallel>, #tpu.dimension_semantics<parallel>], iteration_bounds = array<i64: 1, 2>, scalar_prefetch = 0 : i64, scratch_operands = 0 : i64, tpu.core_type = #tpu.core_type<tc>, window_params = [{transform_indices = @transform_0, window_bounds = array<i64: 6, 128>}, {transform_indices = @transform_1, window_bounds = array<i64: 6, 1>}, {transform_indices = @transform_2, window_bounds = array<i64: 6, 1>}, {transform_indices = @transform_3, window_bounds = array<i64: 6, 128>}]} {
    %c0 = arith.constant 0 : index
    %c0_0 = arith.constant 0 : index
    %0 = vector.load %arg2[%c0, %c0_0] : memref<6x128xf32, #tpu.memory_space<vmem>>, vector<6x128xf32>
    %c0_1 = arith.constant 0 : index
    %c0_2 = arith.constant 0 : index
    %1 = vector.load %arg3[%c0_1, %c0_2] : memref<6x1xf32, #tpu.memory_space<vmem>>, vector<6x1xf32>
    %2 = vector.broadcast %1 : vector<6x1xf32> to vector<6x128xf32>
    %3 = arith.mulf %0, %2 : vector<6x128xf32>
    %c0_3 = arith.constant 0 : index
    %c0_4 = arith.constant 0 : index
    %4 = vector.load %arg4[%c0_3, %c0_4] : memref<6x1xf32, #tpu.memory_space<vmem>>, vector<6x1xf32>
    %5 = vector.broadcast %4 : vector<6x1xf32> to vector<6x128xf32>
    %6 = arith.addf %3, %5 : vector<6x128xf32>
    %c0_5 = arith.constant 0 : index
    %c0_6 = arith.constant 0 : index
    %7 = vector.load %arg5[%c0_5, %c0_6] : memref<6x128xf32, #tpu.memory_space<vmem>>, vector<6x128xf32>
    tpu.vector_store %arg5[%c0_5, %c0_6], %6 {strides = array<i32>} : memref<6x128xf32, #tpu.memory_space<vmem>>, vector<6x128xf32>,
    return
  }
  func.func @transform_0(%arg0: i32, %arg1: i32) -> (i32, i32) {
    %c0_i32 = arith.constant 0 : i32
    return %arg0, %arg1 : i32, i32
  }
  func.func @transform_1(%arg0: i32, %arg1: i32) -> (i32, i32) {
    %c0_i32 = arith.constant 0 : i32
    %c0_i32_0 = arith.constant 0 : i32
    return %arg0, %c0_i32 : i32, i32
  }
  func.func @transform_2(%arg0: i32, %arg1: i32) -> (i32, i32) {
    %c0_i32 = arith.constant 0 : i32
    %c0_i32_0 = arith.constant 0 : i32
    return %arg0, %c0_i32 : i32, i32
  }
  func.func @transform_3(%arg0: i32, %arg1: i32) -> (i32, i32) {
    %c0_i32 = arith.constant 0 : i32
    return %arg0, %arg1 : i32, i32
  }
}

</mosaic_0001>

<bundles_post_ra>
// kernel: _normalizer.1
= control target key start
LH: loop header
LB: loop body
LE: loop exit
PB: predicated region body
PF: predicated region fallthrough
CT: control target
= control target key end

     0   :  { %s448_s12 = smov 0   ;;  %s450_s13 = smov 0   ;;  %s480_s0 = inlined_call_operand.vmem [shape: f32[6,256], index: 0, kind: input, shape index: {}]   ;;  %s481_s1 = inlined_call_operand.vmem [shape: f32[6,1], index: 1, kind: input, shape index: {}]   ;;  %s482_s2 = inlined_call_operand.vmem [shape: f32[6,1], index: 2, kind: input, shape index: {}]   ;;  %s483_s3 = inlined_call_operand.vmem [shape: f32[6,256], index: 3, kind: output, shape index: {}]  }
   0x1   :  { %s452_s14 = smov 0  }
   0x2 LB: > { %s22_s15 = sadd.s32 1, %s421_s13  ;;  %p372_p0 = scmp.ge.s32.totalorder %s425_s14, 1  ;;  %s425_s14 = sphi %s452_s14, %s13_s14   ;;  %s421_s13 = sphi %s450_s13, %s485_s13   ;;  %s417_s12 = sphi %s448_s12, %s484_s12  }
   0x3   : > { %p23_p1 = scmp.ge.s32.totalorder %s22_s15, 2  ;;  %p174_p2 = scmp.lt.s32.totalorder %s425_s14, 3 }
   0x5   : > { %s487_s15 = smov (%p23_p1, %s22_s15), 0  ;;  %p175_p3 = pnand %p372_p0, %p174_p2 }
   0x6   : > { %p214_p4 = scmp.lt.s32.totalorder (!%p175_p3), %s417_s12, 1 }
   0x7   : > { %178 = sbr.rel (%p175_p3) target bundleno = 140 (0x8c), region = 32 }
   0xc   : > { %v237_v0 = vld [vmem:[%s481_s1] sm:$0x3f]  ;;  %v427_v1 = vmov 0   ;;  %s489_s12 = smov (!%p214_p4, %s417_s12), 1 }
   0xd   : > { %402 = vset.pattern.permute.xlu0 %v427_v1  ;;  %v244_v2 = vld [vmem:[%s482_s2] sm:$0x3f]  ;;  %s373_s20 = sshll.u32 %s489_s12, 3 }
   0xe   : > { %240 = vperm.xlu0 %402, %v237_v0   ;;  %s219_s23 = scalar_lea.vmem %s480_s0, %s373_s20  ;;  %s235_s26 = scalar_lea.vmem %s483_s3, %s373_s20 }
   0xf   : > { %v236_v4 = vld [vmem:[%s219_s23] sm:$0x3f] }
  0x16   : > { %247 = vperm.xlu0 %402, %v244_v2  }
  0x80   : > { %v241_v3 = vpop.permute.xlu0 %240 }
  0x81   : > { %v243_v5 = vmul.f32 %v241_v3, %v236_v4 }
  0x88   : > { %v248_v6 = vpop.permute.xlu0 %247 }
  0x89   : > { %v250_v7 = vadd.f32 %v248_v6, %v243_v5 }
  0x8b   : > { %251 = vst [vmem:[%s235_s26] sm:$0x3f] %v250_v7 }
  0x8c PF: > { %s13_s14 = sadd.s32 1, %s425_s14   ;;  %s484_s12 = smov %s421_s13 }
  0x8d   : > { %p10_p5 = scmp.ge.s32.totalorder %s13_s14, 4   ;;  %s485_s13 = smov %s487_s15 }
  0x8f   :  { %12 = sbr.rel (!%p10_p5) target bundleno = 2 (0x2), region = 68 }

</bundles_post_ra>
